<compile_context>
chip_gen: v7x
topology: tpu7x:2x2x1
jax: 0.10.0
libtpu: 0.0.40
codegen_flags: <defaults>
</compile_context>

<pallas_src>
import functools

import jax
import jax.numpy as jnp
from jax.experimental import pallas as pl
from jax.experimental.pallas import tpu as pltpu

# torchvision rgb_to_grayscale weights
_GRAY_W = (0.2989, 0.587, 0.114)
_LANE = 128


def _blend(x1, x2, ratio):
    # torchvision _blend for float images (bound = 1.0)
    return jnp.clip(ratio * x1 + (1.0 - ratio) * x2, 0.0, 1.0)


def _gray(r, g, b):
    return _GRAY_W[0] * r + _GRAY_W[1] * g + _GRAY_W[2] * b


def _rgb2hsv(r, g, b):
    # mirrors torchvision.transforms.functional_tensor._rgb2hsv, with the
    # divides replaced by EUP approx reciprocals + VPU multiplies.
    maxc = jnp.maximum(jnp.maximum(r, g), b)
    minc = jnp.minimum(jnp.minimum(r, g), b)
    eqc = maxc == minc
    cr = maxc - minc
    ones = jnp.ones_like(maxc)
    s = cr * pl.reciprocal(jnp.where(eqc, ones, maxc), approx=True)
    inv_cr = pl.reciprocal(jnp.where(eqc, ones, cr), approx=True)
    rc = (maxc - r) * inv_cr
    gc = (maxc - g) * inv_cr
    bc = (maxc - b) * inv_cr
    hr = jnp.where(maxc == r, bc - gc, 0.0)
    hg = jnp.where((maxc == g) & (maxc != r), 2.0 + rc - bc, 0.0)
    hb = jnp.where((maxc != g) & (maxc != r), 4.0 + gc - rc, 0.0)
    h = jnp.mod((hr + hg + hb) * (1.0 / 6.0) + 1.0, 1.0)
    return h, s, maxc


def _hsv2rgb(h, s, v):
    # mirrors torchvision.transforms.functional_tensor._hsv2rgb, using float
    # sector comparisons (no int cast / int modulo). Clamp handles the rare
    # h == 1.0 rounding edge of jnp.mod.
    h6 = h * 6.0
    i_f = jnp.minimum(jnp.floor(h6), 5.0)
    f = h6 - i_f
    p = jnp.clip(v * (1.0 - s), 0.0, 1.0)
    q = jnp.clip(v * (1.0 - s * f), 0.0, 1.0)
    t = jnp.clip(v * (1.0 - s * (1.0 - f)), 0.0, 1.0)

    def sel(a0, a1, a2, a3, a4, a5):
        return jnp.where(i_f == 0.0, a0,
               jnp.where(i_f == 1.0, a1,
               jnp.where(i_f == 2.0, a2,
               jnp.where(i_f == 3.0, a3,
               jnp.where(i_f == 4.0, a4, a5)))))

    r = sel(v, q, p, p, t, v)
    g = sel(t, v, v, q, p, p)
    b = sel(p, p, t, v, v, q)
    return r, g, b


def _color_jitter_kernel(params_ref, x_ref, o_ref, *, use_hue):
    n = pl.program_id(0)
    base = n * 6
    apply_flag = params_ref[base + 0]
    bright = params_ref[base + 1]
    contrast = params_ref[base + 2]
    sat = params_ref[base + 3]
    hue = params_ref[base + 4]
    mean_gray = params_ref[base + 5]   # hoisted per-image contrast mean

    @pl.when(apply_flag > 0.5)
    def _apply():
        img = x_ref[...]               # (1, 3, TILE_SUB, 128)

        # brightness: blend with zeros
        r = jnp.clip(bright * img[0, 0], 0.0, 1.0)
        g = jnp.clip(bright * img[0, 1], 0.0, 1.0)
        b = jnp.clip(bright * img[0, 2], 0.0, 1.0)

        # contrast: blend with the (precomputed) scalar mean grayscale of the
        # brightness-adjusted image
        r = _blend(r, mean_gray, contrast)
        g = _blend(g, mean_gray, contrast)
        b = _blend(b, mean_gray, contrast)

        # saturation: blend with per-pixel grayscale
        gr = _gray(r, g, b)
        r = _blend(r, gr, sat)
        g = _blend(g, gr, sat)
        b = _blend(b, gr, sat)

        if use_hue:
            # hue: RGB -> HSV, shift hue, HSV -> RGB
            h, s, v = _rgb2hsv(r, g, b)
            h = jnp.mod(h + hue, 1.0)
            r, g, b = _hsv2rgb(h, s, v)

        o_ref[0, 0] = r
        o_ref[0, 1] = g
        o_ref[0, 2] = b

    @pl.when(apply_flag <= 0.5)
    def _copy():
        # coin flip says "do not augment": exact passthrough
        o_ref[...] = x_ref[...]


def color_jitter_pallas(x, params, *, use_hue, tile_sub_target=256):
    """x: (N, 3, H, W) float32 in [0,1]; params: flat (6*N,) float32.

    params layout per image: [apply, bright, contrast, sat, hue, mean_gray].
    """
    n, c, hgt, wid = x.shape
    assert c == 3, "ColorJitter hue/saturation requires RGB (3 channels)"

    # Lane-dense spatial layout: H*W -> (P_pad, 128) sublane x lane tiles.
    length = hgt * wid
    p_sub = pl.cdiv(length, _LANE)
    tile_sub = min(tile_sub_target, ((p_sub + 7) // 8) * 8)
    p_pad = pl.cdiv(p_sub, tile_sub) * tile_sub
    num_tiles = p_pad // tile_sub
    length_pad = p_pad * _LANE

    x_flat = x.reshape(n, c, length)
    if length_pad != length:
        x_flat = jnp.pad(x_flat, ((0, 0), (0, 0), (0, length_pad - length)))
    x_r = x_flat.reshape(n, c, p_pad, _LANE)

    kernel = functools.partial(_color_jitter_kernel, use_hue=use_hue)

    out_r = pl.pallas_call(
        kernel,
        out_shape=jax.ShapeDtypeStruct((n, c, p_pad, _LANE), x.dtype),
        grid_spec=pltpu.PrefetchScalarGridSpec(
            num_scalar_prefetch=1,
            grid=(n, num_tiles),
            in_specs=[pl.BlockSpec((1, c, tile_sub, _LANE),
                                   lambda i, t, prm: (i, 0, t, 0))],
            out_specs=pl.BlockSpec((1, c, tile_sub, _LANE),
                                   lambda i, t, prm: (i, 0, t, 0)),
        ),
        compiler_params=pltpu.CompilerParams(
            dimension_semantics=("parallel", "parallel")),
    )(params, x_r)

    out = out_r.reshape(n, c, length_pad)[:, :, :length]
    return out.reshape(n, c, hgt, wid)


class RandomColorJitterWithProb:
    """JAX/Pallas port of augmentations.augs.RandomColorJitterWithProb."""

    def __init__(self, probability=0.5, brightness_range=(1.0, 1.0),
                 contrast_range=(1.0, 1.0), saturation_range=(1.0, 1.0),
                 hue_range=(0.0, 0.0), target_keys=None):
        self.probability = probability
        self.brightness_range = brightness_range
        self.contrast_range = contrast_range
        self.saturation_range = saturation_range
        self.hue_range = hue_range
        self.target_keys = target_keys if target_keys is not None else ["frame"]
        # static specialization: skip the HSV round trip when hue is disabled
        self.use_hue = not (hue_range[0] == 0.0 and hue_range[1] == 0.0)

    def _sample_params(self, key, x):
        n = x.shape[0]
        k0, k1, k2, k3, k4 = jax.random.split(key, 5)
        apply = (jax.random.uniform(k0, (n,)) < self.probability)
        bf = jax.random.uniform(k1, (n,), minval=self.brightness_range[0],
                                maxval=self.brightness_range[1])
        cf = jax.random.uniform(k2, (n,), minval=self.contrast_range[0],
                                maxval=self.contrast_range[1])
        sf = jax.random.uniform(k3, (n,), minval=self.saturation_range[0],
                                maxval=self.saturation_range[1])
        hf = jax.random.uniform(k4, (n,), minval=self.hue_range[0],
                                maxval=self.hue_range[1])
        # Hoisted contrast mean: grayscale mean of the brightness-adjusted
        # (clipped) image, matching the fixed brightness->contrast order.
        xb = jnp.clip(bf[:, None, None, None] * x, 0.0, 1.0)
        mean_gray = (_GRAY_W[0] * xb[:, 0] + _GRAY_W[1] * xb[:, 1]
                     + _GRAY_W[2] * xb[:, 2]).mean(axis=(1, 2))
        params = jnp.stack([apply.astype(jnp.float32), bf, cf, sf, hf,
                            mean_gray], axis=1)
        return params.reshape(-1).astype(jnp.float32)   # flat (6*N,) for SMEM

    def __call__(self, batch, key):
        for key_name in self.target_keys:
            key, sub = jax.random.split(key)
            x = batch[key_name]
            params = self._sample_params(sub, x)
            batch[key_name] = color_jitter_pallas(x, params,
                                                  use_hue=self.use_hue)
        return batch


if __name__ == "__main__":
    key = jax.random.PRNGKey(0)
    k_data, k_aug = jax.random.split(key)

    N, C, H, W = 2, 3, 16, 16
    frames = jax.random.uniform(k_data, (N, C, H, W), dtype=jnp.float32)
    batch = {"frame": frames}

    aug = RandomColorJitterWithProb(
        probability=0.8,
        brightness_range=(0.8, 1.2),
        contrast_range=(0.7, 1.3),
        saturation_range=(0.6, 1.4),
        hue_range=(-0.1, 0.1),
        target_keys=["frame"],
    )

    out_batch = aug(batch, k_aug)
    out = jax.block_until_ready(out_batch["frame"])
    assert out.shape == (N, C, H, W) and out.dtype == jnp.float32
    assert bool(jnp.all(jnp.isfinite(out)))

    # also exercise the hue-disabled specialization
    aug2 = RandomColorJitterWithProb(
        probability=1.0,
        brightness_range=(0.9, 1.1),
        contrast_range=(0.9, 1.1),
        saturation_range=(0.9, 1.1),
        hue_range=(0.0, 0.0),
        target_keys=["frame"],
    )
    out2 = jax.block_until_ready(aug2({"frame": frames}, k_aug)["frame"])
    assert out2.shape == (N, C, H, W)

    print("KERNEL_OK")
</pallas_src>

<mosaic_0001>
module attributes {stable_mosaic.version = 11 : i64} {
  func.func @_color_jitter_kernel(%arg0: i32, %arg1: i32, %arg2: memref<12xf32, #tpu.memory_space<smem>>, %arg3: memref<1x3x8x128xf32, #tpu.memory_space<vmem>>, %arg4: memref<1x3x8x128xf32, #tpu.memory_space<vmem>>) attributes {dimension_semantics = [#tpu.dimension_semantics<parallel>, #tpu.dimension_semantics<parallel>], iteration_bounds = array<i64: 2, 1>, scalar_prefetch = 1 : i64, scratch_operands = 0 : i64, tpu.core_type = #tpu.core_type<tc>, window_params = [{transform_indices = @transform_0, window_bounds = array<i64: 1, 3, 8, 128>}, {transform_indices = @transform_1, window_bounds = array<i64: 1, 3, 8, 128>}]} {
    %c6_i32 = arith.constant 6 : i32
    %0 = arith.muli %arg0, %c6_i32 : i32
    %c0_i32 = arith.constant 0 : i32
    %1 = arith.addi %0, %c0_i32 : i32
    %2 = arith.index_cast %1 : i32 to index
    %3 = memref.load %arg2[%2] : memref<12xf32, #tpu.memory_space<smem>>
    %c1_i32 = arith.constant 1 : i32
    %4 = arith.addi %0, %c1_i32 : i32
    %5 = arith.index_cast %4 : i32 to index
    %6 = memref.load %arg2[%5] : memref<12xf32, #tpu.memory_space<smem>>
    %c2_i32 = arith.constant 2 : i32
    %7 = arith.addi %0, %c2_i32 : i32
    %8 = arith.index_cast %7 : i32 to index
    %9 = memref.load %arg2[%8] : memref<12xf32, #tpu.memory_space<smem>>
    %c3_i32 = arith.constant 3 : i32
    %10 = arith.addi %0, %c3_i32 : i32
    %11 = arith.index_cast %10 : i32 to index
    %12 = memref.load %arg2[%11] : memref<12xf32, #tpu.memory_space<smem>>
    %c4_i32 = arith.constant 4 : i32
    %13 = arith.addi %0, %c4_i32 : i32
    %14 = arith.index_cast %13 : i32 to index
    %15 = memref.load %arg2[%14] : memref<12xf32, #tpu.memory_space<smem>>
    %c5_i32 = arith.constant 5 : i32
    %16 = arith.addi %0, %c5_i32 : i32
    %17 = arith.index_cast %16 : i32 to index
    %18 = memref.load %arg2[%17] : memref<12xf32, #tpu.memory_space<smem>>
    %cst = arith.constant 5.000000e-01 : f32
    %19 = arith.cmpf ogt, %3, %cst : f32
    %20 = arith.extui %19 : i1 to i32
    %c0_i32_0 = arith.constant 0 : i32
    %21 = arith.cmpi ne, %20, %c0_i32_0 : i32
    scf.if %21 {
      %c0 = arith.constant 0 : index
      %c0_3 = arith.constant 0 : index
      %c0_4 = arith.constant 0 : index
      %c0_5 = arith.constant 0 : index
      %25 = vector.load %arg3[%c0, %c0_3, %c0_4, %c0_5] : memref<1x3x8x128xf32, #tpu.memory_space<vmem>>, vector<1x3x8x128xf32>
      %26 = vector.extract_strided_slice %25 {offsets = [0, 0, 0, 0], sizes = [1, 1, 8, 128], strides = [1, 1, 1, 1]} : vector<1x3x8x128xf32> to vector<1x1x8x128xf32>
      %27 = vector.shape_cast %26 : vector<1x1x8x128xf32> to vector<8x128xf32>
      %28 = vector.broadcast %6 : f32 to vector<8x128xf32>
      %29 = arith.mulf %28, %27 : vector<8x128xf32>
      %cst_6 = arith.constant 0.000000e+00 : f32
      %cst_7 = arith.constant 1.000000e+00 : f32
      %30 = vector.broadcast %cst_6 : f32 to vector<8x128xf32>
      %31 = arith.maximumf %30, %29 : vector<8x128xf32>
      %32 = vector.broadcast %cst_7 : f32 to vector<8x128xf32>
      %33 = arith.minimumf %32, %31 : vector<8x128xf32>
      %34 = vector.extract_strided_slice %25 {offsets = [0, 1, 0, 0], sizes = [1, 1, 8, 128], strides = [1, 1, 1, 1]} : vector<1x3x8x128xf32> to vector<1x1x8x128xf32>
      %35 = vector.shape_cast %34 : vector<1x1x8x128xf32> to vector<8x128xf32>
      %36 = vector.broadcast %6 : f32 to vector<8x128xf32>
      %37 = arith.mulf %36, %35 : vector<8x128xf32>
      %cst_8 = arith.constant 0.000000e+00 : f32
      %cst_9 = arith.constant 1.000000e+00 : f32
      %38 = vector.broadcast %cst_8 : f32 to vector<8x128xf32>
      %39 = arith.maximumf %38, %37 : vector<8x128xf32>
      %40 = vector.broadcast %cst_9 : f32 to vector<8x128xf32>
      %41 = arith.minimumf %40, %39 : vector<8x128xf32>
      %42 = vector.extract_strided_slice %25 {offsets = [0, 2, 0, 0], sizes = [1, 1, 8, 128], strides = [1, 1, 1, 1]} : vector<1x3x8x128xf32> to vector<1x1x8x128xf32>
      %43 = vector.shape_cast %42 : vector<1x1x8x128xf32> to vector<8x128xf32>
      %44 = vector.broadcast %6 : f32 to vector<8x128xf32>
      %45 = arith.mulf %44, %43 : vector<8x128xf32>
      %cst_10 = arith.constant 0.000000e+00 : f32
      %cst_11 = arith.constant 1.000000e+00 : f32
      %46 = vector.broadcast %cst_10 : f32 to vector<8x128xf32>
      %47 = arith.maximumf %46, %45 : vector<8x128xf32>
      %48 = vector.broadcast %cst_11 : f32 to vector<8x128xf32>
      %49 = arith.minimumf %48, %47 : vector<8x128xf32>
      %50 = vector.broadcast %9 : f32 to vector<8x128xf32>
      %51 = arith.mulf %50, %33 : vector<8x128xf32>
      %cst_12 = arith.constant 1.000000e+00 : f32
      %52 = arith.subf %cst_12, %9 : f32
      %53 = arith.mulf %52, %18 : f32
      %54 = vector.broadcast %53 : f32 to vector<8x128xf32>
      %55 = arith.addf %51, %54 : vector<8x128xf32>
      %cst_13 = arith.constant 0.000000e+00 : f32
      %cst_14 = arith.constant 1.000000e+00 : f32
      %56 = vector.broadcast %cst_13 : f32 to vector<8x128xf32>
      %57 = arith.maximumf %56, %55 : vector<8x128xf32>
      %58 = vector.broadcast %cst_14 : f32 to vector<8x128xf32>
      %59 = arith.minimumf %58, %57 : vector<8x128xf32>
      %60 = vector.broadcast %9 : f32 to vector<8x128xf32>
      %61 = arith.mulf %60, %41 : vector<8x128xf32>
      %cst_15 = arith.constant 1.000000e+00 : f32
      %62 = arith.subf %cst_15, %9 : f32
      %63 = arith.mulf %62, %18 : f32
      %64 = vector.broadcast %63 : f32 to vector<8x128xf32>
      %65 = arith.addf %61, %64 : vector<8x128xf32>
      %cst_16 = arith.constant 0.000000e+00 : f32
      %cst_17 = arith.constant 1.000000e+00 : f32
      %66 = vector.broadcast %cst_16 : f32 to vector<8x128xf32>
      %67 = arith.maximumf %66, %65 : vector<8x128xf32>
      %68 = vector.broadcast %cst_17 : f32 to vector<8x128xf32>
      %69 = arith.minimumf %68, %67 : vector<8x128xf32>
      %70 = vector.broadcast %9 : f32 to vector<8x128xf32>
      %71 = arith.mulf %70, %49 : vector<8x128xf32>
      %cst_18 = arith.constant 1.000000e+00 : f32
      %72 = arith.subf %cst_18, %9 : f32
      %73 = arith.mulf %72, %18 : f32
      %74 = vector.broadcast %73 : f32 to vector<8x128xf32>
      %75 = arith.addf %71, %74 : vector<8x128xf32>
      %cst_19 = arith.constant 0.000000e+00 : f32
      %cst_20 = arith.constant 1.000000e+00 : f32
      %76 = vector.broadcast %cst_19 : f32 to vector<8x128xf32>
      %77 = arith.maximumf %76, %75 : vector<8x128xf32>
      %78 = vector.broadcast %cst_20 : f32 to vector<8x128xf32>
      %79 = arith.minimumf %78, %77 : vector<8x128xf32>
      %cst_21 = arith.constant 2.989000e-01 : f32
      %80 = vector.broadcast %cst_21 : f32 to vector<8x128xf32>
      %81 = arith.mulf %80, %59 : vector<8x128xf32>
      %cst_22 = arith.constant 5.870000e-01 : f32
      %82 = vector.broadcast %cst_22 : f32 to vector<8x128xf32>
      %83 = arith.mulf %82, %69 : vector<8x128xf32>
      %84 = arith.addf %81, %83 : vector<8x128xf32>
      %cst_23 = arith.constant 1.140000e-01 : f32
      %85 = vector.broadcast %cst_23 : f32 to vector<8x128xf32>
      %86 = arith.mulf %85, %79 : vector<8x128xf32>
      %87 = arith.addf %84, %86 : vector<8x128xf32>
      %88 = vector.broadcast %12 : f32 to vector<8x128xf32>
      %89 = arith.mulf %88, %59 : vector<8x128xf32>
      %cst_24 = arith.constant 1.000000e+00 : f32
      %90 = arith.subf %cst_24, %12 : f32
      %91 = vector.broadcast %90 : f32 to vector<8x128xf32>
      %92 = arith.mulf %91, %87 : vector<8x128xf32>
      %93 = arith.addf %89, %92 : vector<8x128xf32>
      %cst_25 = arith.constant 0.000000e+00 : f32
      %cst_26 = arith.constant 1.000000e+00 : f32
      %94 = vector.broadcast %cst_25 : f32 to vector<8x128xf32>
      %95 = arith.maximumf %94, %93 : vector<8x128xf32>
      %96 = vector.broadcast %cst_26 : f32 to vector<8x128xf32>
      %97 = arith.minimumf %96, %95 : vector<8x128xf32>
      %98 = vector.broadcast %12 : f32 to vector<8x128xf32>
      %99 = arith.mulf %98, %69 : vector<8x128xf32>
      %cst_27 = arith.constant 1.000000e+00 : f32
      %100 = arith.subf %cst_27, %12 : f32
      %101 = vector.broadcast %100 : f32 to vector<8x128xf32>
      %102 = arith.mulf %101, %87 : vector<8x128xf32>
      %103 = arith.addf %99, %102 : vector<8x128xf32>
      %cst_28 = arith.constant 0.000000e+00 : f32
      %cst_29 = arith.constant 1.000000e+00 : f32
      %104 = vector.broadcast %cst_28 : f32 to vector<8x128xf32>
      %105 = arith.maximumf %104, %103 : vector<8x128xf32>
      %106 = vector.broadcast %cst_29 : f32 to vector<8x128xf32>
      %107 = arith.minimumf %106, %105 : vector<8x128xf32>
      %108 = vector.broadcast %12 : f32 to vector<8x128xf32>
      %109 = arith.mulf %108, %79 : vector<8x128xf32>
      %cst_30 = arith.constant 1.000000e+00 : f32
      %110 = arith.subf %cst_30, %12 : f32
      %111 = vector.broadcast %110 : f32 to vector<8x128xf32>
      %112 = arith.mulf %111, %87 : vector<8x128xf32>
      %113 = arith.addf %109, %112 : vector<8x128xf32>
      %cst_31 = arith.constant 0.000000e+00 : f32
      %cst_32 = arith.constant 1.000000e+00 : f32
      %114 = vector.broadcast %cst_31 : f32 to vector<8x128xf32>
      %115 = arith.maximumf %114, %113 : vector<8x128xf32>
      %116 = vector.broadcast %cst_32 : f32 to vector<8x128xf32>
      %117 = arith.minimumf %116, %115 : vector<8x128xf32>
      %118 = arith.maximumf %97, %107 : vector<8x128xf32>
      %119 = arith.maximumf %118, %117 : vector<8x128xf32>
      %120 = arith.minimumf %97, %107 : vector<8x128xf32>
      %121 = arith.minimumf %120, %117 : vector<8x128xf32>
      %122 = arith.cmpf oeq, %119, %121 : vector<8x128xf32>
      %123 = arith.subf %119, %121 : vector<8x128xf32>
      %cst_33 = arith.constant 1.000000e+00 : f32
      %124 = vector.broadcast %cst_33 : f32 to vector<8x128xf32>
      %125 = arith.select %122, %124, %119 : vector<8x128xi1>, vector<8x128xf32>
      %126 = tpu.reciprocal %125 {approx = true} : vector<8x128xf32> -> vector<8x128xf32>
      %127 = arith.mulf %123, %126 : vector<8x128xf32>
      %128 = arith.select %122, %124, %123 : vector<8x128xi1>, vector<8x128xf32>
      %129 = tpu.reciprocal %128 {approx = true} : vector<8x128xf32> -> vector<8x128xf32>
      %130 = arith.subf %119, %97 : vector<8x128xf32>
      %131 = arith.mulf %130, %129 : vector<8x128xf32>
      %132 = arith.subf %119, %107 : vector<8x128xf32>
      %133 = arith.mulf %132, %129 : vector<8x128xf32>
      %134 = arith.subf %119, %117 : vector<8x128xf32>
      %135 = arith.mulf %134, %129 : vector<8x128xf32>
      %136 = arith.cmpf oeq, %119, %97 : vector<8x128xf32>
      %137 = arith.subf %135, %133 : vector<8x128xf32>
      %cst_34 = arith.constant 0.000000e+00 : f32
      %138 = vector.broadcast %cst_34 : f32 to vector<8x128xf32>
      %139 = arith.select %136, %137, %138 : vector<8x128xi1>, vector<8x128xf32>
      %140 = arith.cmpf oeq, %119, %107 : vector<8x128xf32>
      %141 = arith.cmpf one, %119, %97 : vector<8x128xf32>
      %142 = arith.andi %140, %141 : vector<8x128xi1>
      %cst_35 = arith.constant 2.000000e+00 : f32
      %143 = vector.broadcast %cst_35 : f32 to vector<8x128xf32>
      %144 = arith.addf %143, %131 : vector<8x128xf32>
      %145 = arith.subf %144, %135 : vector<8x128xf32>
      %cst_36 = arith.constant 0.000000e+00 : f32
      %146 = vector.broadcast %cst_36 : f32 to vector<8x128xf32>
      %147 = arith.select %142, %145, %146 : vector<8x128xi1>, vector<8x128xf32>
      %148 = arith.cmpf one, %119, %107 : vector<8x128xf32>
      %149 = arith.cmpf one, %119, %97 : vector<8x128xf32>
      %150 = arith.andi %148, %149 : vector<8x128xi1>
      %cst_37 = arith.constant 4.000000e+00 : f32
      %151 = vector.broadcast %cst_37 : f32 to vector<8x128xf32>
      %152 = arith.addf %151, %133 : vector<8x128xf32>
      %153 = arith.subf %152, %131 : vector<8x128xf32>
      %cst_38 = arith.constant 0.000000e+00 : f32
      %154 = vector.broadcast %cst_38 : f32 to vector<8x128xf32>
      %155 = arith.select %150, %153, %154 : vector<8x128xi1>, vector<8x128xf32>
      %156 = arith.addf %139, %147 : vector<8x128xf32>
      %157 = arith.addf %156, %155 : vector<8x128xf32>
      %cst_39 = arith.constant 0.166666672 : f32
      %158 = vector.broadcast %cst_39 : f32 to vector<8x128xf32>
      %159 = arith.mulf %157, %158 : vector<8x128xf32>
      %cst_40 = arith.constant 1.000000e+00 : f32
      %160 = vector.broadcast %cst_40 : f32 to vector<8x128xf32>
      %161 = arith.addf %159, %160 : vector<8x128xf32>
      %cst_41 = arith.constant 1.000000e+00 : f32
      %162 = vector.broadcast %cst_41 : f32 to vector<8x128xf32>
      %163 = arith.remf %161, %162 : vector<8x128xf32>
      %cst_42 = arith.constant 0.000000e+00 : f32
      %164 = vector.broadcast %cst_42 : f32 to vector<8x128xf32>
      %165 = arith.cmpf one, %163, %164 : vector<8x128xf32>
      %cst_43 = arith.constant 0.000000e+00 : f32
      %166 = vector.broadcast %cst_43 : f32 to vector<8x128xf32>
      %167 = arith.cmpf olt, %163, %166 : vector<8x128xf32>
      %cst_44 = arith.constant 0.000000e+00 : f32
      %168 = arith.cmpf olt, %cst_41, %cst_44 : f32
      %169 = vector.broadcast %168 : i1 to vector<8x128xi1>
      %170 = vector.broadcast %169 : vector<8x128xi1> to vector<8x128xi1>
      %171 = arith.xori %167, %170 : vector<8x128xi1>
      %172 = arith.andi %171, %165 : vector<8x128xi1>
      %173 = vector.broadcast %cst_41 : f32 to vector<8x128xf32>
      %174 = arith.addf %163, %173 : vector<8x128xf32>
      %175 = arith.select %172, %174, %163 : vector<8x128xi1>, vector<8x128xf32>
      %176 = vector.broadcast %15 : f32 to vector<8x128xf32>
      %177 = arith.addf %175, %176 : vector<8x128xf32>
      %cst_45 = arith.constant 1.000000e+00 : f32
      %178 = vector.broadcast %cst_45 : f32 to vector<8x128xf32>
      %179 = arith.remf %177, %178 : vector<8x128xf32>
      %cst_46 = arith.constant 0.000000e+00 : f32
      %180 = vector.broadcast %cst_46 : f32 to vector<8x128xf32>
      %181 = arith.cmpf one, %179, %180 : vector<8x128xf32>
      %cst_47 = arith.constant 0.000000e+00 : f32
      %182 = vector.broadcast %cst_47 : f32 to vector<8x128xf32>
      %183 = arith.cmpf olt, %179, %182 : vector<8x128xf32>
      %cst_48 = arith.constant 0.000000e+00 : f32
      %184 = arith.cmpf olt, %cst_45, %cst_48 : f32
      %185 = vector.broadcast %184 : i1 to vector<8x128xi1>
      %186 = vector.broadcast %185 : vector<8x128xi1> to vector<8x128xi1>
      %187 = arith.xori %183, %186 : vector<8x128xi1>
      %188 = arith.andi %187, %181 : vector<8x128xi1>
      %189 = vector.broadcast %cst_45 : f32 to vector<8x128xf32>
      %190 = arith.addf %179, %189 : vector<8x128xf32>
      %191 = arith.select %188, %190, %179 : vector<8x128xi1>, vector<8x128xf32>
      %cst_49 = arith.constant 6.000000e+00 : f32
      %192 = vector.broadcast %cst_49 : f32 to vector<8x128xf32>
      %193 = arith.mulf %191, %192 : vector<8x128xf32>
      %194 = math.floor %193 : vector<8x128xf32>
      %cst_50 = arith.constant 5.000000e+00 : f32
      %195 = vector.broadcast %cst_50 : f32 to vector<8x128xf32>
      %196 = arith.minimumf %194, %195 : vector<8x128xf32>
      %197 = arith.subf %193, %196 : vector<8x128xf32>
      %cst_51 = arith.constant 1.000000e+00 : f32
      %198 = vector.broadcast %cst_51 : f32 to vector<8x128xf32>
      %199 = arith.subf %198, %127 : vector<8x128xf32>
      %200 = arith.mulf %119, %199 : vector<8x128xf32>
      %cst_52 = arith.constant 0.000000e+00 : f32
      %cst_53 = arith.constant 1.000000e+00 : f32
      %201 = vector.broadcast %cst_52 : f32 to vector<8x128xf32>
      %202 = arith.maximumf %201, %200 : vector<8x128xf32>
      %203 = vector.broadcast %cst_53 : f32 to vector<8x128xf32>
      %204 = arith.minimumf %203, %202 : vector<8x128xf32>
      %205 = arith.mulf %127, %197 : vector<8x128xf32>
      %cst_54 = arith.constant 1.000000e+00 : f32
      %206 = vector.broadcast %cst_54 : f32 to vector<8x128xf32>
      %207 = arith.subf %206, %205 : vector<8x128xf32>
      %208 = arith.mulf %119, %207 : vector<8x128xf32>
      %cst_55 = arith.constant 0.000000e+00 : f32
      %cst_56 = arith.constant 1.000000e+00 : f32
      %209 = vector.broadcast %cst_55 : f32 to vector<8x128xf32>
      %210 = arith.maximumf %209, %208 : vector<8x128xf32>
      %211 = vector.broadcast %cst_56 : f32 to vector<8x128xf32>
      %212 = arith.minimumf %211, %210 : vector<8x128xf32>
      %cst_57 = arith.constant 1.000000e+00 : f32
      %213 = vector.broadcast %cst_57 : f32 to vector<8x128xf32>
      %214 = arith.subf %213, %197 : vector<8x128xf32>
      %215 = arith.mulf %127, %214 : vector<8x128xf32>
      %cst_58 = arith.constant 1.000000e+00 : f32
      %216 = vector.broadcast %cst_58 : f32 to vector<8x128xf32>
      %217 = arith.subf %216, %215 : vector<8x128xf32>
      %218 = arith.mulf %119, %217 : vector<8x128xf32>
      %cst_59 = arith.constant 0.000000e+00 : f32
      %cst_60 = arith.constant 1.000000e+00 : f32
      %219 = vector.broadcast %cst_59 : f32 to vector<8x128xf32>
      %220 = arith.maximumf %219, %218 : vector<8x128xf32>
      %221 = vector.broadcast %cst_60 : f32 to vector<8x128xf32>
      %222 = arith.minimumf %221, %220 : vector<8x128xf32>
      %cst_61 = arith.constant 0.000000e+00 : f32
      %223 = vector.broadcast %cst_61 : f32 to vector<8x128xf32>
      %224 = arith.cmpf oeq, %196, %223 : vector<8x128xf32>
      %cst_62 = arith.constant 1.000000e+00 : f32
      %225 = vector.broadcast %cst_62 : f32 to vector<8x128xf32>
      %226 = arith.cmpf oeq, %196, %225 : vector<8x128xf32>
      %cst_63 = arith.constant 2.000000e+00 : f32
      %227 = vector.broadcast %cst_63 : f32 to vector<8x128xf32>
      %228 = arith.cmpf oeq, %196, %227 : vector<8x128xf32>
      %cst_64 = arith.constant 3.000000e+00 : f32
      %229 = vector.broadcast %cst_64 : f32 to vector<8x128xf32>
      %230 = arith.cmpf oeq, %196, %229 : vector<8x128xf32>
      %cst_65 = arith.constant 4.000000e+00 : f32
      %231 = vector.broadcast %cst_65 : f32 to vector<8x128xf32>
      %232 = arith.cmpf oeq, %196, %231 : vector<8x128xf32>
      %233 = arith.select %232, %222, %119 : vector<8x128xi1>, vector<8x128xf32>
      %234 = arith.select %230, %204, %233 : vector<8x128xi1>, vector<8x128xf32>
      %235 = arith.select %228, %204, %234 : vector<8x128xi1>, vector<8x128xf32>
      %236 = arith.select %226, %212, %235 : vector<8x128xi1>, vector<8x128xf32>
      %237 = arith.select %224, %119, %236 : vector<8x128xi1>, vector<8x128xf32>
      %cst_66 = arith.constant 0.000000e+00 : f32
      %238 = vector.broadcast %cst_66 : f32 to vector<8x128xf32>
      %239 = arith.cmpf oeq, %196, %238 : vector<8x128xf32>
      %cst_67 = arith.constant 1.000000e+00 : f32
      %240 = vector.broadcast %cst_67 : f32 to vector<8x128xf32>
      %241 = arith.cmpf oeq, %196, %240 : vector<8x128xf32>
      %cst_68 = arith.constant 2.000000e+00 : f32
      %242 = vector.broadcast %cst_68 : f32 to vector<8x128xf32>
      %243 = arith.cmpf oeq, %196, %242 : vector<8x128xf32>
      %cst_69 = arith.constant 3.000000e+00 : f32
      %244 = vector.broadcast %cst_69 : f32 to vector<8x128xf32>
      %245 = arith.cmpf oeq, %196, %244 : vector<8x128xf32>
      %cst_70 = arith.constant 4.000000e+00 : f32
      %246 = vector.broadcast %cst_70 : f32 to vector<8x128xf32>
      %247 = arith.cmpf oeq, %196, %246 : vector<8x128xf32>
      %248 = arith.select %247, %204, %204 : vector<8x128xi1>, vector<8x128xf32>
      %249 = arith.select %245, %212, %248 : vector<8x128xi1>, vector<8x128xf32>
      %250 = arith.select %243, %119, %249 : vector<8x128xi1>, vector<8x128xf32>
      %251 = arith.select %241, %119, %250 : vector<8x128xi1>, vector<8x128xf32>
      %252 = arith.select %239, %222, %251 : vector<8x128xi1>, vector<8x128xf32>
      %cst_71 = arith.constant 0.000000e+00 : f32
      %253 = vector.broadcast %cst_71 : f32 to vector<8x128xf32>
      %254 = arith.cmpf oeq, %196, %253 : vector<8x128xf32>
      %cst_72 = arith.constant 1.000000e+00 : f32
      %255 = vector.broadcast %cst_72 : f32 to vector<8x128xf32>
      %256 = arith.cmpf oeq, %196, %255 : vector<8x128xf32>
      %cst_73 = arith.constant 2.000000e+00 : f32
      %257 = vector.broadcast %cst_73 : f32 to vector<8x128xf32>
      %258 = arith.cmpf oeq, %196, %257 : vector<8x128xf32>
      %cst_74 = arith.constant 3.000000e+00 : f32
      %259 = vector.broadcast %cst_74 : f32 to vector<8x128xf32>
      %260 = arith.cmpf oeq, %196, %259 : vector<8x128xf32>
      %cst_75 = arith.constant 4.000000e+00 : f32
      %261 = vector.broadcast %cst_75 : f32 to vector<8x128xf32>
      %262 = arith.cmpf oeq, %196, %261 : vector<8x128xf32>
      %263 = arith.select %262, %119, %212 : vector<8x128xi1>, vector<8x128xf32>
      %264 = arith.select %260, %119, %263 : vector<8x128xi1>, vector<8x128xf32>
      %265 = arith.select %258, %222, %264 : vector<8x128xi1>, vector<8x128xf32>
      %266 = arith.select %256, %204, %265 : vector<8x128xi1>, vector<8x128xf32>
      %267 = arith.select %254, %204, %266 : vector<8x128xi1>, vector<8x128xf32>
      %c0_76 = arith.constant 0 : index
      %c0_77 = arith.constant 0 : index
      %c0_78 = arith.constant 0 : index
      %c0_79 = arith.constant 0 : index
      %268 = vector.load %arg4[%c0_76, %c0_77, %c0_78, %c0_79] : memref<1x3x8x128xf32, #tpu.memory_space<vmem>>, vector<1x1x8x128xf32>
      %269 = vector.shape_cast %268 : vector<1x1x8x128xf32> to vector<8x128xf32>
      %270 = vector.shape_cast %237 : vector<8x128xf32> to vector<1x1x8x128xf32>
      tpu.vector_store %arg4[%c0_76, %c0_77, %c0_78, %c0_79], %270 {strides = array<i32>} : memref<1x3x8x128xf32, #tpu.memory_space<vmem>>, vector<1x1x8x128xf32>,
      %c0_80 = arith.constant 0 : index
      %c1 = arith.constant 1 : index
      %c0_81 = arith.constant 0 : index
      %c0_82 = arith.constant 0 : index
      %271 = vector.load %arg4[%c0_80, %c1, %c0_81, %c0_82] : memref<1x3x8x128xf32, #tpu.memory_space<vmem>>, vector<1x1x8x128xf32>
      %272 = vector.shape_cast %271 : vector<1x1x8x128xf32> to vector<8x128xf32>
      %273 = vector.shape_cast %252 : vector<8x128xf32> to vector<1x1x8x128xf32>
      tpu.vector_store %arg4[%c0_80, %c1, %c0_81, %c0_82], %273 {strides = array<i32>} : memref<1x3x8x128xf32, #tpu.memory_space<vmem>>, vector<1x1x8x128xf32>,
      %c0_83 = arith.constant 0 : index
      %c2 = arith.constant 2 : index
      %c0_84 = arith.constant 0 : index
      %c0_85 = arith.constant 0 : index
      %274 = vector.load %arg4[%c0_83, %c2, %c0_84, %c0_85] : memref<1x3x8x128xf32, #tpu.memory_space<vmem>>, vector<1x1x8x128xf32>
      %275 = vector.shape_cast %274 : vector<1x1x8x128xf32> to vector<8x128xf32>
      %276 = vector.shape_cast %267 : vector<8x128xf32> to vector<1x1x8x128xf32>
      tpu.vector_store %arg4[%c0_83, %c2, %c0_84, %c0_85], %276 {strides = array<i32>} : memref<1x3x8x128xf32, #tpu.memory_space<vmem>>, vector<1x1x8x128xf32>,
    } else {
    }
    %cst_1 = arith.constant 5.000000e-01 : f32
    %22 = arith.cmpf ole, %3, %cst_1 : f32
    %23 = arith.extui %22 : i1 to i32
    %c0_i32_2 = arith.constant 0 : i32
    %24 = arith.cmpi ne, %23, %c0_i32_2 : i32
    scf.if %24 {
      %c0 = arith.constant 0 : index
      %c0_3 = arith.constant 0 : index
      %c0_4 = arith.constant 0 : index
      %c0_5 = arith.constant 0 : index
      %25 = vector.load %arg3[%c0, %c0_3, %c0_4, %c0_5] : memref<1x3x8x128xf32, #tpu.memory_space<vmem>>, vector<1x3x8x128xf32>
      %c0_6 = arith.constant 0 : index
      %c0_7 = arith.constant 0 : index
      %c0_8 = arith.constant 0 : index
      %c0_9 = arith.constant 0 : index
      %26 = vector.load %arg4[%c0_6, %c0_7, %c0_8, %c0_9] : memref<1x3x8x128xf32, #tpu.memory_space<vmem>>, vector<1x3x8x128xf32>
      tpu.vector_store %arg4[%c0_6, %c0_7, %c0_8, %c0_9], %25 {strides = array<i32>} : memref<1x3x8x128xf32, #tpu.memory_space<vmem>>, vector<1x3x8x128xf32>,
    } else {
    }
    return
  }
  func.func @transform_0(%arg0: i32, %arg1: i32, %arg2: memref<12xf32, #tpu.memory_space<smem>>) -> (i32, i32, i32, i32) {
    %c0_i32 = arith.constant 0 : i32
    %c0_i32_0 = arith.constant 0 : i32
    %c0_i32_1 = arith.constant 0 : i32
    return %arg0, %c0_i32, %arg1, %c0_i32_0 : i32, i32, i32, i32
  }
  func.func @transform_1(%arg0: i32, %arg1: i32, %arg2: memref<12xf32, #tpu.memory_space<smem>>) -> (i32, i32, i32, i32) {
    %c0_i32 = arith.constant 0 : i32
    %c0_i32_0 = arith.constant 0 : i32
    %c0_i32_1 = arith.constant 0 : i32
    return %arg0, %c0_i32, %arg1, %c0_i32_0 : i32, i32, i32, i32
  }
}

</mosaic_0001>

<bundles_post_ra>
// kernel: tpu_custom_call.1
= control target key start
LH: loop header
LB: loop body
LE: loop exit
PB: predicated region body
PF: predicated region fallthrough
CT: control target
= control target key end

     0   :  { %s924_s0 = inlined_call_operand.hbm [shape: f32[12], index: 0, kind: input, shape index: {}]   ;;  %s925_s1 = inlined_call_operand.hbm [shape: f32[2,3,8,128], index: 1, kind: input, shape index: {}]   ;;  %s926_s2 = inlined_call_operand.hbm [shape: f32[2,3,8,128], index: 2, kind: output, shape index: {}]  }
   0x1   :  { %s529_s11 = scalar_lea.hbm %s924_s0, 16 }
   0x2   :  { %p530_p0 = scmp.ne.s32.totalorder %s924_s0, %s529_s11  ;;  %p533_p1 = scmp.lt.u32.totalorder %s529_s11, %s924_s0 }
   0x4   :  { %p535_p2 = pnand %p533_p1, %p530_p0 }
   0x6   :  { %538 = shalt.err (!%p535_p2)  }
   0x7   :  { %s655_s16 = smov [#allocation3]  }
   0x8   :  { %8 = dma.hbm_to_smem %s924_s0, 16, %s655_s16, [#allocation2] }
   0x9   :  { %621 = dma.done.wait [#allocation2], 16 }
   0xa   :  { %622 = vsyncadd [#allocation2], 4294967280 }
   0xb   :  { %10 = sfence }
   0xc   :  { %11 = vsyncpa [#allocation5], 0 }
   0xd   :  { %13 = vsyncpa [#allocation5 + $0x1], 0 }
   0xe   :  { %14 = vsyncpa [#allocation6], 0 }
   0xf   :  { %16 = vsyncpa [#allocation6 + $0x1], 0  ;;  %s689_s19 = smov 0   ;;  %s691_s20 = smov 0  }
  0x10   :  { %s693_s21 = smov 0   ;;  %s695_s22 = smov 0  }
  0x11   :  { %s697_s23 = smov 0   ;;  %s699_s24 = smov 0  }
  0x12 LB: > { %s443_s0 = sadd.s32 4294967295, %s653_s24   ;;  %s444_s25 = sadd.s32 4294967294, %s653_s24   ;;  %s653_s24 = sphi %s699_s24, %s22_s24   ;;  %s649_s23 = sphi %s697_s23, %s941_s23   ;;  %s645_s22 = sphi %s695_s22, %s940_s22   ;;  %s641_s21 = sphi %s693_s21, %s939_s21   ;;  %s637_s20 = sphi %s691_s20, %s938_s20   ;;  %s633_s19 = sphi %s689_s19, %s937_s19  }
  0x13   : > { %s34_s26 = sadd.s32 1, %s649_s23  ;;  %s43_s27 = sadd.s32 1, %s641_s21 }
  0x14   : > { %p36_p3 = scmp.ge.s32.totalorder %s34_s26, 2  ;;  %p50_p4 = scmp.ne.s32.totalorder %s641_s21, %s637_s20 }
  0x15   : > { %p51_p5 = scmp.eq.s32.totalorder %s653_s24, 0  ;;  %p56_p6 = scmp.ne.s32.totalorder %s637_s20, %s633_s19 }
  0x16   : > { %s943_s26 = smov (%p36_p3, %s34_s26), 0  ;;  %p57_p8 = scmp.eq.s32.totalorder %s443_s0, 0 }
  0x17   : > { %p730_p7 = por %p51_p5, %p50_p4  ;;  %s38_s29 = ssub.s32 %s649_s23, %s943_s26 }
  0x18   : > { %p82_p9 = scmp.eq.s32.totalorder %s443_s0, 1  ;;  %p41_p10 = scmp.eq.s32.totalorder %s38_s29, 0 }
  0x19   : > { %p736_p11 = por %p57_p8, %p56_p6  ;;  %p88_p13 = scmp.eq.s32.totalorder %s444_s25, 1 }
  0x1a   : > { %p740_p12 = por %p82_p9, %p50_p4  ;;  %p470_p2 = scmp.lt.s32.totalorder %s653_s24, 2 }
  0x1b   : > { %s745_s4 = scalar_select %p41_p10, %s641_s21, %s43_s27  }
  0x1c   : > { %s930_s3 = scalar_select %p740_p12, 1, 0 }
  0x1d   : > { %p747_p0 = por %p88_p13, %p56_p6  ;;  %s108_s6 = sand.u32 1, %s641_s21  }
  0x1e   : > { %s454_s7 = smul.u32 24, %s108_s6  ;;  %p757_p3 = pnand %p470_p2, %p730_p7 }
  0x1f   : > { %s931_s5 = scalar_select %p747_p0, 1, 0 }
  0x20   : > { %s455_s8 = smul.u32 384, %s649_s23  ;;  %s112_s13 = scalar_lea.vmem [#allocation4], %s454_s7 }
  0x21   : > { %s120_s14 = sshll.u32 %s112_s13, 4  ;;  %s769_s15 = scalar_lea.sflag [#allocation5], %s108_s6  ;;  %s766_s14 = int_to_ptr.vmem [resolvable:$true] %s120_s14 }
  0x22   : > { %s764_s12 = scalar_lea.hbm %s925_s1, %s455_s8  ;;  %p541_p6 = pneg %p757_p3 }
  0x23   : > { %s539_s16 = scalar_lea.hbm %s764_s12, 384  ;;  %s544_s0 = scalar_lea.hbm %s925_s1, 768 }
  0x24   : > { %p540_p5 = scmp.ne.s32.totalorder %s764_s12, %s539_s16  ;;  %p545_p9 = scmp.lt.u32.totalorder %s764_s12, %s925_s1 }
  0x25   : > { %p546_p10 = scmp.lt.u32.totalorder %s544_s0, %s539_s16  ;;  %p548_p2 = scmp.lt.u32.totalorder %s539_s16, %s764_s12 }
  0x26   : > { %p542_p7 = pnand %p541_p6, %p540_p5 }
  0x27   : > { %p547_p13 = por %p546_p10, %p545_p9 }
  0x28   : > { %p543_p8 = pneg %p542_p7 }
  0x29   : > { %p549_p1 = por %p548_p2, %p547_p13 }
  0x2b   : > { %p550_p4 = pnand %p549_p1, %p543_p8 }
  0x2d   : > { %553 = shalt.err (!%p550_p4)
}
  0x2e   : > { %s554_s28 = scalar_lea.vmem %s766_s14, 384  ;;  %s656_s29 = smov [#allocation4]  }
  0x2f   : > { %p555_p5 = scmp.ne.s32.totalorder %s766_s14, %s554_s28  ;;  %s559_s6 = sshll.u32 %s656_s29, 4  ;;  %s560_s6 = int_to_ptr.vmem [resolvable:$false] %s559_s6 }
  0x30   : > { %s561_s7 = scalar_lea.vmem %s560_s6, 768  ;;  %p562_p12 = scmp.lt.s32.totalorder %s766_s14, %s560_s6 }
  0x31   : > { %p557_p7 = pnand %p555_p5, %p541_p6  ;;  %p563_p9 = scmp.lt.s32.totalorder %s561_s7, %s554_s28 }
  0x33   : > { %p558_p0 = pneg %p557_p7  ;;  %p564_p10 = por %p563_p9, %p562_p12 }
  0x35   : > { %p565_p13 = pnand %p564_p10, %p558_p0 }
  0x37   : > { %568 = shalt.err (!%p565_p13)
}
  0x38   : > { %s657_s8 = smov 128   ;;  %s658_s10 = smov 8  }
  0x39   : > { %465 = dma.hbm_to_vmem [thread:$0]  (!%p757_p3), %s764_s12, 384, %s766_s14, %s769_s15, %s657_s8, %s657_s8, %s658_s10  }
  0x3a   : > { %p128_p1 = scmp.lt.s32.totalorder %s653_s24, 3  ;;  %p933_p4 = scmp.ge.s32.totalorder %s653_s24, 1 }
  0x3c   : > { %p129_p6 = pnand %p933_p4, %p128_p1 }
  0x3d   : > { %s801_s11 = sand.u32 (!%p129_p6), 1, %s637_s20  }
  0x3e   : > { %132 = sbr.rel (%p129_p6) target bundleno = 234 (0xea), region = 24  ;;  %s135_s16 = scalar_lea.sflag (!%p129_p6), [#allocation5], %s801_s11 }
  0x3f   : > { %s456_s13 = smul.u32 (!%p129_p6), 24, %s801_s11 }
  0x41   : > { %s805_s17 = scalar_lea.vmem (!%p129_p6), [#allocation4], %s456_s13 }
  0x45   : > { %624 = dma.done.wait (%p736_p11), %s135_s16, 384  }
  0x46   : > { %626 = vsyncadd (%p736_p11), %s135_s16, 4294966912  ;;  %s157_s9 = smul.u32 6, %s645_s22  ;;  %s819_s30 = scalar_lea.vmem [#allocation7], %s456_s13 }
  0x48   : > { %s812_s12 = sld [smem:[#allocation3 + %s157_s9]]  ;;  %s159_s14 = sadd.s32 1, %s157_s9 }
  0x49   : > { %s160_s15 = sld [smem:[#allocation3 + %s159_s14]]  ;;  %s161_s18 = sadd.s32 2, %s157_s9 }
  0x4a   : > { %s162_s0 = sld [smem:[#allocation3 + %s161_s18]]  ;;  %s163_s25 = sadd.s32 3, %s157_s9 }
  0x4b   : > { %s814_s27 = sld [smem:[#allocation3 + %s163_s25]]  ;;  %s165_s28 = sadd.s32 4, %s157_s9 }
  0x4c   : > { %s816_s29 = sld [smem:[#allocation3 + %s165_s28]]  ;;  %s167_s6 = sadd.s32 5, %s157_s9 }
  0x4d   : > { %s168_s7 = sld [smem:[#allocation3 + %s167_s6]] }
  0x4e   : > { %p169_p12 = scmp.gt.f32.partialorder %s812_s12, 0.5 }
  0x4f   : > { %v173_v0 = vld [vmem:[%s805_s17] sm:$0xff] (%p169_p12)  ;;  %v174_v1 = vld [vmem:[%s805_s17 + $0x8] sm:$0xff] (%p169_p12)  ;;  %v175_v2 = vld [vmem:[%s805_s17 + $0x10] sm:$0xff] (%p169_p12)  ;;  %v176_v3 = vstv (%p169_p12), %s160_s15 }
  0x50   : > { %172 = sbr.rel (!%p169_p12) target bundleno = 199 (0xc7), region = 32  ;;  %s188_s8 = ssub.f32 (%p169_p12), 1.0, %s162_s0  ;;  %v177_v4 = vmul.f32 (%p169_p12), %v176_v3, %v173_v0  ;;  %v180_v5 = vmul.f32 (%p169_p12), %v176_v3, %v174_v1  ;;  %v183_v6 = vmul.f32 (%p169_p12), %v176_v3, %v175_v2  ;;  %v186_v10 = vstv (%p169_p12), %s162_s0 }
  0x51   : > { %s209_s13 = ssub.f32 (%p169_p12), 1.0, %s814_s27  ;;  %v207_v30 = vstv (%p169_p12), %s814_s27 }
  0x52   : > { %v178_v7 = vmax.f32 (%p169_p12), %v177_v4, 0.0  ;;  %v181_v8 = vmax.f32 (%p169_p12), %v180_v5, 0.0  ;;  %v184_v9 = vmax.f32 (%p169_p12), %v183_v6, 0.0 }
  0x53   : > { %s189_s10 = smul.f32 (%p169_p12), %s188_s8, %s168_s7  ;;  %v210_v32 = vstv (%p169_p12), %s209_s13 }
  0x54   : > { %v179_v11 = vmin.f32 (%p169_p12), %v178_v7, 1.0  ;;  %v182_v12 = vmin.f32 (%p169_p12), %v181_v8, 1.0  ;;  %v185_v13 = vmin.f32 (%p169_p12), %v184_v9, 1.0 }
  0x55   : > { %v190_v14 = vstv (%p169_p12), %s189_s10 }
  0x56   : > { %v187_v15 = vmul.f32 (%p169_p12), %v186_v10, %v179_v11  ;;  %v194_v16 = vmul.f32 (%p169_p12), %v186_v10, %v182_v12  ;;  %v198_v17 = vmul.f32 (%p169_p12), %v186_v10, %v185_v13 }
  0x58   : > { %v191_v18 = vadd.f32 %v190_v14, %v187_v15  ;;  %v195_v19 = vadd.f32 %v194_v16, %v190_v14  ;;  %v199_v20 = vadd.f32 %v198_v17, %v190_v14  ;;  %v273_v16 = vstv %s816_s29 }
  0x5a   : > { %v192_v21 = vmax.f32 %v191_v18, 0.0  ;;  %v196_v22 = vmax.f32 %v195_v19, 0.0  ;;  %v200_v23 = vmax.f32 %v199_v20, 0.0 }
  0x5c   : > { %v193_v24 = vmin.f32 %v192_v21, 1.0  ;;  %v197_v25 = vmin.f32 %v196_v22, 1.0  ;;  %v201_v26 = vmin.f32 %v200_v23, 1.0 }
  0x5e   : > { %v202_v27 = vmul.f32 0.2989, %v193_v24  ;;  %v203_v28 = vmul.f32 0.587, %v197_v25  ;;  %v205_v29 = vmul.f32 0.114, %v201_v26  ;;  %v208_v34 = vmul.f32 %v207_v30, %v193_v24 }
  0x5f   : > { %v215_v35 = vmul.f32 %v207_v30, %v197_v25  ;;  %v219_v36 = vmul.f32 %v207_v30, %v201_v26 }
  0x60   : > { %v204_v31 = vadd.f32 %v203_v28, %v202_v27 }
  0x62   : > { %v206_v33 = vadd.f32 %v205_v29, %v204_v31 }
  0x64   : > { %v211_v37 = vmul.f32 %v210_v32, %v206_v33 }
  0x66   : > { %v212_v38 = vadd.f32 %v211_v37, %v208_v34  ;;  %v216_v39 = vadd.f32 %v215_v35, %v211_v37  ;;  %v220_v40 = vadd.f32 %v219_v36, %v211_v37 }
  0x68   : > { %v213_v41 = vmax.f32 %v212_v38, 0.0  ;;  %v217_v42 = vmax.f32 %v216_v39, 0.0  ;;  %v221_v43 = vmax.f32 %v220_v40, 0.0 }
  0x6a   : > { %v214_v44 = vmin.f32 %v213_v41, 1.0  ;;  %v218_v45 = vmin.f32 %v217_v42, 1.0  ;;  %v222_v46 = vmin.f32 %v221_v43, 1.0 }
  0x6c   : > { %v223_v47 = vmax.f32 %v214_v44, %v218_v45  ;;  %v225_v48 = vmin.f32 %v214_v44, %v218_v45 }
  0x6e   : > { %v826_v49 = vmax.f32 %v223_v47, %v222_v46  ;;  %v226_v50 = vmin.f32 %v225_v48, %v222_v46 }
  0x70   : > { %vm227_vm0 = vcmp.eq.f32.partialorder %v826_v49, %v226_v50  ;;  %v228_v51 = vsub.f32 %v826_v49, %v226_v50  ;;  %v234_v53 = vsub.f32 %v826_v49, %v214_v44  ;;  %v236_v54 = vsub.f32 %v826_v49, %v218_v45 }
  0x71   : > { %v238_v55 = vsub.f32 %v826_v49, %v222_v46  ;;  %vm243_vm1 = vcmp.eq.f32.partialorder %v826_v49, %v218_v45  ;;  %vm244_vm2 = vcmp.ne.f32.partialorder %v826_v49, %v214_v44  ;;  %vm249_vm3 = vcmp.ne.f32.partialorder %v826_v49, %v218_v45 }
  0x72   : > { %v232_v52 = vsel %vm227_vm0, 1.0, %v228_v51  ;;  %vm240_vm4 = vcmp.eq.f32.partialorder %v826_v49, %v214_v44  ;;  %vm245_vm5 = vmand %vm243_vm1, %vm244_vm2  ;;  %v229_v19 = vsel %vm227_vm0, 1.0, %v826_v49 }
  0x73   : > { %525 = vrcp.f32 %v232_v52  ;;  %vm250_vm6 = vmand %vm249_vm3, %vm244_vm2 }
  0x74   : > { %527 = vrcp.f32 %v229_v19 }
  0x7d   : > { %v526_v56 = vpop.eup %525 }
  0x7e   : > { %v235_v57 = vmul.f32 %v526_v56, %v234_v53  ;;  %v237_v58 = vmul.f32 %v526_v56, %v236_v54  ;;  %v239_v59 = vmul.f32 %v526_v56, %v238_v55  ;;  %v528_v27 = vpop.eup %527 }
  0x7f   : > { %v231_v30 = vmul.f32 %v528_v27, %v228_v51 }
  0x80   : > { %v241_v60 = vsub.f32 %v239_v59, %v237_v58  ;;  %v246_v61 = vadd.f32 2.0, %v235_v57  ;;  %v251_v62 = vadd.f32 4.0, %v237_v58 }
  0x81   : > { %v294_v33 = vsub.f32 1.0, %v231_v30 }
  0x82   : > { %v242_v63 = vsel %vm240_vm4, %v241_v60, 0.0  ;;  %v247_v0 = vsub.f32 %v246_v61, %v239_v59  ;;  %v252_v1 = vsub.f32 %v251_v62, %v235_v57 }
  0x83   : > { %v295_v36 = vmul.f32 %v294_v33, %v826_v49 }
  0x84   : > { %v248_v2 = vsel %vm245_vm5, %v247_v0, 0.0  ;;  %v253_v3 = vsel %vm250_vm6, %v252_v1, 0.0 }
  0x85   : > { %v254_v4 = vadd.f32 %v248_v2, %v242_v63  ;;  %v296_v39 = vmax.f32 %v295_v36, 0.0 }
  0x87   : > { %v255_v5 = vadd.f32 %v254_v4, %v253_v3  ;;  %v297_v44 = vmin.f32 %v296_v39, 1.0 }
  0x89   : > { %v256_v6 = vmul.f32 0.16666667, %v255_v5 }
  0x8b   : > { %v257_v7 = vadd.f32 1.0, %v256_v6 }
  0x8d   : > { %v258_v8 = vand.u32 2147483647, %v257_v7  ;;  %v266_v11 = vand.u32 2147483648, %v257_v7 }
  0x8f   : > { %v261_v9 = vfloor.f32 %v258_v8 }
  0x91   : > { %v262_v10 = vsub.f32 %v258_v8, %v261_v9 }
  0x93   : > { %vm263_vm7 = vcmp.eq.f32.partialorder %v262_v10, 1.0 }
  0x94   : > { %v264_v12 = vsel %vm263_vm7, 0.0, %v262_v10 }
  0x95   : > { %v265_v13 = vand.u32 2147483647, %v264_v12 }
  0x97   : > { %v267_v14 = vor.u32 %v266_v11, %v265_v13 }
  0x99   : > { %vm268_vm8 = vcmp.ne.f32.partialorder %v267_v14, 0.0  ;;  %vm269_vm9 = vcmp.lt.f32.partialorder %v267_v14, 0.0  ;;  %v271_v15 = vadd.f32 1.0, %v267_v14 }
  0x9a   : > { %vm270_vm10 = vmand %vm269_vm9, %vm268_vm8 }
  0x9b   : > { %v272_v17 = vsel %vm270_vm10, %v271_v15, %v267_v14 }
  0x9c   : > { %v274_v18 = vadd.f32 %v273_v16, %v272_v17 }
  0x9e   : > { %v275_v20 = vand.u32 2147483647, %v274_v18  ;;  %v283_v23 = vand.u32 2147483648, %v274_v18 }
  0xa0   : > { %v278_v21 = vfloor.f32 %v275_v20 }
  0xa2   : > { %v279_v22 = vsub.f32 %v275_v20, %v278_v21 }
  0xa4   : > { %vm280_vm11 = vcmp.eq.f32.partialorder %v279_v22, 1.0 }
  0xa5   : > { %v281_v24 = vsel %vm280_vm11, 0.0, %v279_v22 }
  0xa6   : > { %v282_v25 = vand.u32 2147483647, %v281_v24 }
  0xa8   : > { %v284_v26 = vor.u32 %v283_v23, %v282_v25 }
  0xaa   : > { %vm285_vm12 = vcmp.ne.f32.partialorder %v284_v26, 0.0  ;;  %vm286_vm13 = vcmp.lt.f32.partialorder %v284_v26, 0.0  ;;  %v288_v28 = vadd.f32 1.0, %v284_v26 }
  0xab   : > { %vm287_vm14 = vmand %vm286_vm13, %vm285_vm12 }
  0xac   : > { %v289_v29 = vsel %vm287_vm14, %v288_v28, %v284_v26 }
  0xad   : > { %v290_v31 = vmul.f32 6.0, %v289_v29 }
  0xaf   : > { %v291_v32 = vfloor.f32 %v290_v31 }
  0xb1   : > { %v292_v34 = vmin.f32 %v291_v32, 5.0 }
  0xb3   : > { %v293_v35 = vsub.f32 %v290_v31, %v292_v34  ;;  %vm312_vm15 = vcmp.eq.f32.partialorder %v292_v34, 3.0  ;;  %vm313_vm0 = vcmp.eq.f32.partialorder %v292_v34, 4.0  ;;  %vm311_vm1 = vcmp.eq.f32.partialorder %v292_v34, 2.0 }
  0xb4   : > { %vm310_vm2 = vcmp.eq.f32.partialorder %v292_v34, 1.0  ;;  %vm309_vm3 = vcmp.eq.f32.partialorder %v292_v34, 0.0 }
  0xb5   : > { %v298_v37 = vmul.f32 %v293_v35, %v231_v30  ;;  %v303_v38 = vsub.f32 1.0, %v293_v35 }
  0xb7   : > { %v299_v40 = vsub.f32 1.0, %v298_v37  ;;  %v304_v41 = vmul.f32 %v303_v38, %v231_v30 }
  0xb9   : > { %v300_v42 = vmul.f32 %v299_v40, %v826_v49  ;;  %v305_v43 = vsub.f32 1.0, %v304_v41 }
  0xbb   : > { %v301_v45 = vmax.f32 %v300_v42, 0.0  ;;  %v306_v46 = vmul.f32 %v305_v43, %v826_v49 }
  0xbd   : > { %v302_v47 = vmin.f32 %v301_v45, 1.0  ;;  %v307_v48 = vmax.f32 %v306_v46, 0.0 }
  0xbf   : > { %v308_v50 = vmin.f32 %v307_v48, 1.0  ;;  %v319_v51 = vsel %vm312_vm15, %v302_v47, %v297_v44  ;;  %v323_v52 = vsel %vm313_vm0, %v826_v49, %v302_v47 }
  0xc0   : > { %v320_v53 = vsel %vm311_vm1, %v826_v49, %v319_v51  ;;  %v324_v54 = vsel %vm312_vm15, %v826_v49, %v323_v52 }
  0xc1   : > { %v314_v55 = vsel %vm313_vm0, %v308_v50, %v826_v49  ;;  %v321_v56 = vsel %vm310_vm2, %v826_v49, %v320_v53  ;;  %v325_v57 = vsel %vm311_vm1, %v308_v50, %v324_v54 }
  0xc2   : > { %v315_v58 = vsel %vm312_vm15, %v297_v44, %v314_v55  ;;  %v322_v59 = vsel %vm309_vm3, %v308_v50, %v321_v56  ;;  %v326_v60 = vsel %vm310_vm2, %v297_v44, %v325_v57 }
  0xc3   : > { %v316_v61 = vsel %vm311_vm1, %v297_v44, %v315_v58  ;;  %449 = vst [vmem:[%s819_s30 + $0x8] sm:$0xff] %v322_v59  ;;  %v327_v62 = vsel %vm309_vm3, %v297_v44, %v326_v60 }
  0xc4   : > { %v317_v63 = vsel %vm310_vm2, %v302_v47, %v316_v61  ;;  %450 = vst [vmem:[%s819_s30 + $0x10] sm:$0xff] %v327_v62 }
  0xc5   : > { %v318_v0 = vsel %vm309_vm3, %v826_v49, %v317_v63 }
  0xc6   : > { %328 = vst [vmem:[%s819_s30] sm:$0xff] %v318_v0 }
  0xc7 PF: > { %p333_p11 = scmp.le.f32.partialorder %s812_s12, 0.5 }
  0xc8   : > { %v337_v1 = vld [vmem:[%s805_s17] sm:$0xff] (%p333_p11)  ;;  %v338_v2 = vld [vmem:[%s805_s17 + $0x8] sm:$0xff] (%p333_p11)  ;;  %v339_v3 = vld [vmem:[%s805_s17 + $0x10] sm:$0xff] (%p333_p11) }
  0xc9   : > { %336 = sbr.rel (!%p333_p11) target bundleno = 208 (0xd0), region = 36  ;;  %340 = vst [vmem:[%s819_s30] sm:$0xff] (%p333_p11), %v337_v1  ;;  %341 = vst [vmem:[%s819_s30 + $0x8] sm:$0xff] (%p333_p11), %v338_v2 }
  0xca   : > { %342 = vst [vmem:[%s819_s30 + $0x10] sm:$0xff] (%p333_p11), %v339_v3 }
  0xd0 PF: > { %s457_s16 = smul.u32 384, %s645_s22  ;;  %s358_s9 = sshll.u32 %s819_s30, 4  ;;  %s875_s9 = int_to_ptr.vmem [resolvable:$true] %s358_s9 }
  0xd1   : > { %s344_s17 = scalar_lea.sflag [#allocation6], %s801_s11  ;;  %s569_s18 = scalar_lea.vmem %s875_s9, 384 }
  0xd2   : > { %s873_s15 = scalar_lea.hbm %s926_s2, %s457_s16  ;;  %p570_p0 = scmp.ne.s32.totalorder %s875_s9, %s569_s18 }
  0xd3   : > { %p934_p3 = scmp.ne.s32.totalorder %s930_s3, 0  ;;  %s659_s0 = smov [#allocation7]  }
  0xd4   : > { %s573_s25 = sshll.u32 %s659_s0, 4  ;;  %s574_s25 = int_to_ptr.vmem [resolvable:$false] %s573_s25 }
  0xd5   : > { %p571_p8 = pnand %p570_p0, %p934_p3  ;;  %s575_s22 = scalar_lea.vmem %s574_s25, 768 }
  0xd6   : > { %p576_p5 = scmp.lt.s32.totalorder %s875_s9, %s574_s25  ;;  %p577_p7 = scmp.lt.s32.totalorder %s575_s22, %s569_s18 }
  0xd7   : > { %p572_p2 = pneg %p571_p8 }
  0xd8   : > { %p578_p9 = por %p577_p7, %p576_p5 }
  0xda   : > { %p579_p10 = pnand %p578_p9, %p572_p2 }
  0xdc   : > { %582 = shalt.err (!%p579_p10)
}
  0xdd   : > { %s583_s27 = scalar_lea.hbm %s873_s15, 384  ;;  %s587_s6 = scalar_lea.hbm %s926_s2, 768 }
  0xde   : > { %p584_p13 = scmp.ne.s32.totalorder %s873_s15, %s583_s27  ;;  %p588_p6 = scmp.lt.u32.totalorder %s873_s15, %s926_s2 }
  0xdf   : > { %p589_p12 = scmp.lt.u32.totalorder %s587_s6, %s583_s27  ;;  %p591_p0 = scmp.lt.u32.totalorder %s583_s27, %s873_s15 }
  0xe0   : > { %p585_p1 = pnand %p584_p13, %p934_p3 }
  0xe1   : > { %p590_p11 = por %p589_p12, %p588_p6 }
  0xe2   : > { %p586_p4 = pneg %p585_p1 }
  0xe3   : > { %p592_p8 = por %p591_p0, %p590_p11 }
  0xe5   : > { %p593_p2 = pnand %p592_p8, %p586_p4 }
  0xe7   : > { %596 = shalt.err (!%p593_p2)
}
  0xe8   : > { %s660_s8 = smov 128   ;;  %s661_s10 = smov 8  }
  0xe9   : > { %460 = dma.vmem_to_hbm [thread:$0]  (%p934_p3), %s875_s9, 384, %s873_s15, %s344_s17, %s660_s8, %s660_s8, %s661_s10  }
  0xea PF: > { %s373_s13 = sand.u32 1, %s633_s19   ;;  %p935_p5 = scmp.ne.s32.totalorder %s931_s5, 0 }
  0xeb   : > { %p936_p7 = scmp.ge.s32.totalorder %s653_s24, 2  ;;  %s374_s16 = scalar_lea.sflag [#allocation6], %s373_s13 }
  0xed   : > { %p467_p9 = pnand %p936_p7, %p935_p5 }
  0xef   : > { %628 = dma.done.wait (!%p467_p9), %s374_s16, 384  }
  0xf0   : > { %630 = vsyncadd (!%p467_p9), %s374_s16, 4294966912  ;;  %s22_s24 = sadd.s32 1, %s653_s24   ;;  %s937_s19 = smov %s637_s20 }
  0xf1   : > { %p19_p10 = scmp.ge.s32.totalorder %s22_s24, 4   ;;  %s938_s20 = smov %s641_s21 }
  0xf2   : > { %s939_s21 = smov %s745_s4  ;;  %s940_s22 = smov %s649_s23 }
  0xf3   : > { %s941_s23 = smov %s943_s26  ;;  %21 = sbr.rel (!%p19_p10) target bundleno = 18 (0x12), region = 79 }
  0xfa   :  { %379 = vsyncpa [#allocation5], 1 }
  0xfb   :  { %381 = vsyncpa [#allocation5 + $0x1], 1 }
  0xfc   :  { %382 = vsyncpa [#allocation6], 1 }
  0xfd   :  { %384 = vsyncpa [#allocation6 + $0x1], 1 }

</bundles_post_ra>
